<compile_context>
chip_gen: v7x
topology: tpu7x:2x2x1
jax: 0.10.0
libtpu: 0.0.40
codegen_flags: <defaults>
</compile_context>

<pallas_src>
import functools

import jax
import jax.numpy as jnp
from jax.experimental import pallas as pl
from jax.experimental.pallas import tpu as pltpu

_LANE = 128
_SUBLANE = 8
_TILE = _LANE * _SUBLANE          # 1024 elements = one dense f32 vreg tile
_BLOCK_ROWS = 512                 # (512,128) f32 block = 256 KiB per buffer


# --------------------------------------------------------------------------
# Kernel A: per-step (N == 1) path.  Everything in SMEM, pure scalar ALU.
# --------------------------------------------------------------------------
def _scalar_update_kernel(loss_ref, sum_ref, cnt_ref, sum_out_ref, cnt_out_ref):
    # loss_ref: (1,) f32 SMEM; sum refs: (1,1) f32 SMEM; cnt refs: (1,) i32 SMEM
    sum_out_ref[0, 0] = sum_ref[0, 0] + loss_ref[0]
    cnt_out_ref[0] = cnt_ref[0] + 1


@functools.partial(jax.jit, donate_argnums=(1, 2))
def _scalar_update(loss1, sum_buf, count_buf):
    return pl.pallas_call(
        _scalar_update_kernel,
        out_shape=(
            jax.ShapeDtypeStruct((1, 1), jnp.float32),
            jax.ShapeDtypeStruct((1,), jnp.int32),
        ),
        in_specs=[
            pl.BlockSpec(memory_space=pltpu.SMEM),   # loss (scalar path only)
            pl.BlockSpec(memory_space=pltpu.SMEM),   # sum   (aliased -> out 0)
            pl.BlockSpec(memory_space=pltpu.SMEM),   # count (aliased -> out 1)
        ],
        out_specs=(
            pl.BlockSpec(memory_space=pltpu.SMEM),
            pl.BlockSpec(memory_space=pltpu.SMEM),
        ),
        input_output_aliases={1: 0, 2: 1},
        cost_estimate=pl.CostEstimate(flops=2, transcendentals=0,
                                      bytes_accessed=24),
    )(loss1, sum_buf, count_buf)


# --------------------------------------------------------------------------
# Kernel B: batched path.  Lane-dense (rows, 128) slab, 1-D grid over row
# blocks, resident (1,1) VMEM accumulator, true count via SMEM scalar.
# --------------------------------------------------------------------------
def _batched_update_kernel(n_ref, losses_ref, sum_ref, cnt_ref,
                           sum_out_ref, cnt_out_ref, acc_ref):
    i = pl.program_id(0)

    @pl.when(i == 0)
    def _():
        acc_ref[...] = jnp.zeros_like(acc_ref)

    # Block-local reduce (padded entries are zero, so they don't affect sum).
    acc_ref[...] += jnp.sum(losses_ref[...])

    @pl.when(i == pl.num_programs(0) - 1)
    def _():
        sum_out_ref[...] = sum_ref[...] + acc_ref[...]
        cnt_out_ref[0] = cnt_ref[0] + n_ref[0]   # true count, not padded size


@functools.partial(jax.jit, donate_argnums=(2, 3))
def _batched_update(slab, n_arr, sum_buf, count_buf):
    rows = slab.shape[0]
    block_rows = min(rows, _BLOCK_ROWS)
    grid = rows // block_rows   # rows is a power-of-two multiple of 8, exact
    return pl.pallas_call(
        _batched_update_kernel,
        out_shape=(
            jax.ShapeDtypeStruct((1, 1), jnp.float32),
            jax.ShapeDtypeStruct((1,), jnp.int32),
        ),
        grid=(grid,),
        in_specs=[
            pl.BlockSpec(memory_space=pltpu.SMEM),                 # true N
            pl.BlockSpec((block_rows, _LANE), lambda i: (i, 0)),   # losses slab
            pl.BlockSpec((1, 1), lambda i: (0, 0)),                # sum (resident)
            pl.BlockSpec(memory_space=pltpu.SMEM),                 # count
        ],
        out_specs=(
            pl.BlockSpec((1, 1), lambda i: (0, 0)),
            pl.BlockSpec(memory_space=pltpu.SMEM),
        ),
        scratch_shapes=[pltpu.VMEM((1, 1), jnp.float32)],
        input_output_aliases={2: 0, 3: 1},
        compiler_params=pltpu.CompilerParams(
            dimension_semantics=("arbitrary",),       # reduction axis
            vmem_limit_bytes=8 * 1024 * 1024,         # safe on v5e/v6e/v7x
        ),
        cost_estimate=pl.CostEstimate(
            flops=slab.size, transcendentals=0,
            bytes_accessed=4 * slab.size + 16),
    )(n_arr, slab, sum_buf, count_buf)


def _bucket_elems(n):
    """Pad element count to a power-of-two number of (8,128) vreg tiles.

    Keeps the jit cache to a handful of shapes instead of one per distinct N.
    """
    tiles = max(1, pl.cdiv(max(n, 1), _TILE))
    tiles = pl.next_power_of_2(tiles)
    return tiles * _TILE


# --------------------------------------------------------------------------
# JAX-side mirror of the PyTorch module (buffers held as jnp arrays).
# --------------------------------------------------------------------------
class LossEmpty:

    def __init__(self, name="empty"):
        self.name = name
        self.weight = 1
        self.required = None
        # register_buffer('sum', zeros(1)) / register_buffer('count', zeros(1))
        self.sum = jnp.zeros((1, 1), jnp.float32)   # (1,1): valid VMEM & SMEM block
        self.count = jnp.zeros((1,), jnp.int32)     # 1-D SMEM scalar, exact count

    def __call__(self, loss):
        # forward(loss): update state, return nothing.  All-SMEM scalar kernel.
        loss1 = jnp.asarray(loss, jnp.float32).reshape(1)
        self.sum, self.count = _scalar_update(loss1, self.sum, self.count)

    def update_batch(self, losses):
        # Equivalent to calling forward once per element of `losses`.
        flat = jnp.ravel(jnp.asarray(losses, jnp.float32))
        n = flat.shape[0]
        padded = _bucket_elems(n)
        if padded != n:
            flat = jnp.pad(flat, (0, padded - n))   # zero pad -> sum unchanged
        slab = flat.reshape(padded // _LANE, _LANE)  # lane/sublane-dense layout
        n_arr = jnp.full((1,), n, jnp.int32)         # true count (not padded)
        self.sum, self.count = _batched_update(slab, n_arr, self.sum, self.count)

    def __str__(self):
        # Host sync only happens here (logging time), never in the update path.
        cnt = int(self.count[0])
        if cnt == 0:
            return "0"
        return str(float(self.sum[0, 0]) / cnt)


if __name__ == "__main__":
    key = jax.random.PRNGKey(0)

    # Small batch of scalar "loss" values (what a train loop would produce).
    losses = jax.random.uniform(key, (8,), dtype=jnp.float32)
    # Larger batch to exercise the multi-block grid path (rows > _BLOCK_ROWS).
    big = jax.random.uniform(jax.random.fold_in(key, 1), (70_000,),
                             dtype=jnp.float32)

    module = LossEmpty("empty")
    module.update_batch(losses)   # batched kernel, grid = 1
    module(losses[0])             # scalar all-SMEM kernel (N = 1)
    module.update_batch(big)      # batched kernel, grid > 1 (pipelined blocks)

    jax.block_until_ready(module.sum)
    jax.block_until_ready(module.count)

    # Verify against a plain-JAX reference of the accumulation semantics.
    ref_sum = jnp.sum(losses) + losses[0] + jnp.sum(big)
    ref_count = losses.shape[0] + 1 + big.shape[0]
    assert jnp.allclose(module.sum[0, 0], ref_sum, rtol=1e-4, atol=1e-2), (
        float(module.sum[0, 0]), float(ref_sum))
    assert int(module.count[0]) == ref_count, (int(module.count[0]), ref_count)
    _ = str(module)  # exercise __str__ (mean of accumulated losses)

    print("KERNEL_OK")
</pallas_src>

<mosaic_0001>
module attributes {stable_mosaic.version = 11 : i64} {
  func.func @_batched_update_kernel(%arg0: i32, %arg1: memref<1xi32, #tpu.memory_space<smem>>, %arg2: memref<8x128xf32, #tpu.memory_space<vmem>>, %arg3: memref<1x1xf32, #tpu.memory_space<vmem>>, %arg4: memref<1xi32, #tpu.memory_space<smem>>, %arg5: memref<1x1xf32, #tpu.memory_space<vmem>>, %arg6: memref<1xi32, #tpu.memory_space<smem>>, %arg7: memref<1x1xf32, #tpu.memory_space<vmem>>) attributes {dimension_semantics = [#tpu.dimension_semantics<arbitrary>], iteration_bounds = array<i64: 1>, scalar_prefetch = 0 : i64, scratch_operands = 1 : i64, tpu.core_type = #tpu.core_type<tc>, window_params = [{transform_indices = @transform_0, window_bounds = array<i64: 1>}, {transform_indices = @transform_1, window_bounds = array<i64: 8, 128>}, {pipeline_mode = #tpu.pipeline_mode<synchronous>, transform_indices = @transform_2, window_bounds = array<i64: 1, 1>}, {transform_indices = @transform_3, window_bounds = array<i64: 1>}, {pipeline_mode = #tpu.pipeline_mode<synchronous>, transform_indices = @transform_4, window_bounds = array<i64: 1, 1>}, {transform_indices = @transform_5, window_bounds = array<i64: 1>}]} {
    %c0_i32 = arith.constant 0 : i32
    %0 = arith.cmpi eq, %arg0, %c0_i32 : i32
    %1 = arith.extui %0 : i1 to i32
    %c0_i32_0 = arith.constant 0 : i32
    %2 = arith.cmpi ne, %1, %c0_i32_0 : i32
    scf.if %2 {
      %cst_8 = arith.constant 0.000000e+00 : f32
      %15 = vector.broadcast %cst_8 : f32 to vector<1x1xf32>
      %c0_9 = arith.constant 0 : index
      %c0_10 = arith.constant 0 : index
      %16 = vector.load %arg7[%c0_9, %c0_10] : memref<1x1xf32, #tpu.memory_space<vmem>>, vector<1x1xf32>
      tpu.vector_store %arg7[%c0_9, %c0_10], %15 {strides = array<i32>} : memref<1x1xf32, #tpu.memory_space<vmem>>, vector<1x1xf32>,
    } else {
    }
    %c0 = arith.constant 0 : index
    %c0_1 = arith.constant 0 : index
    %3 = vector.load %arg7[%c0, %c0_1] : memref<1x1xf32, #tpu.memory_space<vmem>>, vector<1x1xf32>
    %c0_2 = arith.constant 0 : index
    %c0_3 = arith.constant 0 : index
    %4 = vector.load %arg2[%c0_2, %c0_3] : memref<8x128xf32, #tpu.memory_space<vmem>>, vector<8x128xf32>
    %5 = vector.shape_cast %4 : vector<8x128xf32> to vector<1x8x128xf32>
    %cst = arith.constant dense<0.000000e+00> : vector<1xf32>
    %6 = vector.multi_reduction <add>, %5, %cst [1, 2] : vector<1x8x128xf32> to vector<1xf32>
    %7 = vector.shape_cast %6 : vector<1xf32> to vector<1x1x1xf32>
    %8 = vector.extract %7[0, 0, 0] : f32 from vector<1x1x1xf32>
    %9 = vector.broadcast %8 : f32 to vector<1x1xf32>
    %10 = arith.addf %3, %9 : vector<1x1xf32>
    %c0_4 = arith.constant 0 : index
    %c0_5 = arith.constant 0 : index
    %11 = vector.load %arg7[%c0_4, %c0_5] : memref<1x1xf32, #tpu.memory_space<vmem>>, vector<1x1xf32>
    tpu.vector_store %arg7[%c0_4, %c0_5], %10 {strides = array<i32>} : memref<1x1xf32, #tpu.memory_space<vmem>>, vector<1x1xf32>,
    %c0_i32_6 = arith.constant 0 : i32
    %12 = arith.cmpi eq, %arg0, %c0_i32_6 : i32
    %13 = arith.extui %12 : i1 to i32
    %c0_i32_7 = arith.constant 0 : i32
    %14 = arith.cmpi ne, %13, %c0_i32_7 : i32
    scf.if %14 {
      %c0_8 = arith.constant 0 : index
      %c0_9 = arith.constant 0 : index
      %15 = vector.load %arg3[%c0_8, %c0_9] : memref<1x1xf32, #tpu.memory_space<vmem>>, vector<1x1xf32>
      %c0_10 = arith.constant 0 : index
      %c0_11 = arith.constant 0 : index
      %16 = vector.load %arg7[%c0_10, %c0_11] : memref<1x1xf32, #tpu.memory_space<vmem>>, vector<1x1xf32>
      %17 = arith.addf %15, %16 : vector<1x1xf32>
      %c0_12 = arith.constant 0 : index
      %c0_13 = arith.constant 0 : index
      %18 = vector.load %arg5[%c0_12, %c0_13] : memref<1x1xf32, #tpu.memory_space<vmem>>, vector<1x1xf32>
      tpu.vector_store %arg5[%c0_12, %c0_13], %17 {strides = array<i32>} : memref<1x1xf32, #tpu.memory_space<vmem>>, vector<1x1xf32>,
      %c0_14 = arith.constant 0 : index
      %19 = memref.load %arg4[%c0_14] : memref<1xi32, #tpu.memory_space<smem>>
      %c0_15 = arith.constant 0 : index
      %20 = memref.load %arg1[%c0_15] : memref<1xi32, #tpu.memory_space<smem>>
      %21 = arith.addi %19, %20 : i32
      %c0_16 = arith.constant 0 : index
      %22 = memref.load %arg6[%c0_16] : memref<1xi32, #tpu.memory_space<smem>>
      memref.store %21, %arg6[%c0_16] : memref<1xi32, #tpu.memory_space<smem>>
    } else {
    }
    return
  }
  func.func @transform_0(%arg0: i32) -> i32 {
    %c0_i32 = arith.constant 0 : i32
    %c0_i32_0 = arith.constant 0 : i32
    return %c0_i32 : i32
  }
  func.func @transform_1(%arg0: i32) -> (i32, i32) {
    %c0_i32 = arith.constant 0 : i32
    %c0_i32_0 = arith.constant 0 : i32
    return %arg0, %c0_i32 : i32, i32
  }
  func.func @transform_2(%arg0: i32) -> (i32, i32) {
    %c0_i32 = arith.constant 0 : i32
    %c0_i32_0 = arith.constant 0 : i32
    %c0_i32_1 = arith.constant 0 : i32
    return %c0_i32, %c0_i32_0 : i32, i32
  }
  func.func @transform_3(%arg0: i32) -> i32 {
    %c0_i32 = arith.constant 0 : i32
    %c0_i32_0 = arith.constant 0 : i32
    return %c0_i32 : i32
  }
  func.func @transform_4(%arg0: i32) -> (i32, i32) {
    %c0_i32 = arith.constant 0 : i32
    %c0_i32_0 = arith.constant 0 : i32
    %c0_i32_1 = arith.constant 0 : i32
    return %c0_i32, %c0_i32_0 : i32, i32
  }
  func.func @transform_5(%arg0: i32) -> i32 {
    %c0_i32 = arith.constant 0 : i32
    %c0_i32_0 = arith.constant 0 : i32
    return %c0_i32 : i32
  }
}

</mosaic_0001>

<bundles_post_ra>
// kernel: _batched_update.1
= control target key start
LH: loop header
LB: loop body
LE: loop exit
PB: predicated region body
PF: predicated region fallthrough
CT: control target
= control target key end

     0   :  { %s198_s0 = inlined_call_operand.<no memory space> [shape: s32[1], index: 0, kind: input, shape index: {}]   ;;  %s199_s1 = inlined_call_operand.vmem [shape: f32[8,128], index: 1, kind: input, shape index: {}]   ;;  %s200_s2 = inlined_call_operand.<no memory space> [shape: f32[1,1], index: 2, kind: input, shape index: {}, may-alias: {2,4}]   ;;  %s201_s3 = inlined_call_operand.<no memory space> [shape: s32[1], index: 3, kind: input, shape index: {}, may-alias: {3,5}]   ;;  %s202_s4 = inlined_call_operand.hbm [shape: f32[1,1], index: 4, kind: output, shape index: {0}, may-alias: {2,4}]   ;;  %s203_s5 = inlined_call_operand.hbm [shape: s32[1], index: 5, kind: output, shape index: {1}, may-alias: {3,5}]  }
   0x1   :  { %v12_v0 = vstv %s200_s2 }
   0x2   :  { %13 = vst [vmem:[#allocation4] sm:$0x1] %v12_v0 }
   0x3   :  { %15 = vsyncpa [#allocation7], 0  ;;  %v32_v1 = vld [vmem:[%s199_s1] sm:$0xff] }
   0x4   :  { %16 = vsyncpa [#allocation8], 0  ;;  %33 = vadd.xlane.f32.xlu0 %v32_v1  ;;  %vm29_vm0 = vcmask 0   ;;  %v126_v2 = vmov 0.0   ;;  %s55_s26 = sadd.s32 %s201_s3, %s198_s0  ;;  %s90_s28 = scalar_lea.hbm %s203_s5, 16 }
   0x5   :  { %30 = vst.msk [vmem:[#allocation2] sm:$0x1] %vm29_vm0, %v126_v2  ;;  %57 = sst [smem:[#allocation9]] %s55_s26  ;;  %p91_p0 = scmp.ne.s32.totalorder %s203_s5, %s90_s28 }
   0x6   :  { %p94_p1 = scmp.lt.u32.totalorder %s90_s28, %s203_s5 }
   0x8   :  { %p96_p2 = pnand %p94_p1, %p91_p0 }
   0xa   :  { %99 = shalt.err (!%p96_p2)
}
   0xb   :  { %s127_s7 = smov [#allocation9]   ;;  %v49_v13 = vld [vmem:[#allocation4] sm:$0x1]  ;;  %s128_s3 = smov [#allocation6]  }
   0xc   :  { %75 = dma.smem_to_hbm %s127_s7, 16, %s203_s5, [#allocation8]   ;;  %v31_v10 = vld [vmem:[#allocation2] sm:$0x1] }
   0xd   :  { %s64_s10 = sshll.u32 %s128_s3, 4  ;;  %s65_s10 = int_to_ptr.vmem [resolvable:$true] %s64_s10 }
   0xe   :  { %s100_s5 = scalar_lea.vmem %s65_s10, 16  ;;  %s104_s11 = scalar_lea.vmem %s65_s10, 32 }
   0xf   :  { %p101_p3 = scmp.ne.s32.totalorder %s65_s10, %s100_s5  ;;  %p105_p4 = scmp.lt.s32.totalorder %s65_s10, %s65_s10 }
  0x10   :  { %p106_p5 = scmp.lt.s32.totalorder %s104_s11, %s100_s5 }
  0x12   :  { %p107_p6 = por %p106_p5, %p105_p4 }
  0x14   :  { %p108_p7 = pnand %p107_p6, %p101_p3 }
  0x91   :  { %v34_v3 = vpop.xlane.xlu0 %33 }
  0x92   :  { %v35_v4 = vrot.slane %v34_v3, 4 }
  0x94   :  { %v36_v5 = vadd.f32 %v35_v4, %v34_v3 }
  0x96   :  { %v37_v6 = vrot.slane %v36_v5, 2 }
  0x98   :  { %v38_v7 = vadd.f32 %v37_v6, %v36_v5 }
  0x9a   :  { %v39_v8 = vrot.slane %v38_v7, 1 }
  0x9c   :  { %v40_v9 = vadd.f32 %v39_v8, %v38_v7 }
  0x9e   :  { %85 = vpush %v40_v9 }
  0xcf   :  { %s86_s0 = spop %85 }
  0xd0   :  { %v42_v11 = vstv %s86_s0 }
  0xd1   :  { %v43_v12 = vadd.f32 %v42_v11, %v31_v10 }
  0xd3   :  { %45 = vst.msk [vmem:[#allocation2] sm:$0x1] %vm29_vm0, %v43_v12 }
  0xda   :  { %v50_v14 = vld [vmem:[#allocation2] sm:$0x1] }
  0xdb   :  { %v51_v15 = vadd.f32 %v50_v14, %v49_v13 }
  0xdd   :  { %52 = vst.msk [vmem:[#allocation6] sm:$0x1] %vm29_vm0, %v51_v15 }
  0xde   :  { %111 = shalt.err (!%p108_p7)
}
  0xdf   :  { %s112_s14 = scalar_lea.hbm %s202_s4, 16 }
  0xe0   :  { %p113_p8 = scmp.ne.s32.totalorder %s202_s4, %s112_s14  ;;  %p116_p9 = scmp.lt.u32.totalorder %s112_s14, %s202_s4 }
  0xe2   :  { %p118_p10 = pnand %p116_p9, %p113_p8 }
  0xe4   :  { %121 = shalt.err (!%p118_p10)
}
  0xe5   :  { %67 = dma.vmem_to_hbm [thread:$0]  %s65_s10, 16, %s202_s4, [#allocation7]  }
  0xe6   :  { %122 = dma.done.wait [#allocation7], 16  }
  0xe7   :  { %123 = vsyncadd [#allocation7], 4294967280 }
  0xe8   :  { %124 = dma.done.wait [#allocation8], 16  }
  0xe9   :  { %125 = vsyncadd [#allocation8], 4294967280 }
  0xea   :  { %82 = sfence }
  0xeb   :  { %83 = vsyncpa [#allocation7], 1 }
  0xec   :  { %84 = vsyncpa [#allocation8], 1 }

</bundles_post_ra>
